<compile_context>
chip_gen: v5e
topology: v5e:2x2
jax: 0.10.0
libtpu: 0.0.40
codegen_flags: <defaults>
</compile_context>

<pallas_src>
import functools

import jax
import jax.numpy as jnp
import numpy as np
from jax import lax
from jax.experimental import pallas as pl
from jax.experimental.pallas import tpu as pltpu

LANES = 128  # slab strip width == output lane width


# ----------------------------------------------------------------------------
# glue: pack 2-D arrays (each with shape[1] <= width) into one row-stacked slab
# ----------------------------------------------------------------------------
def _pack_slab(entries, dtype, *, width=LANES, row_align=16, total_align=None):
    """entries: list of (name, 2-D array). Returns (slab, {name: (row, k, n)})."""
    total_align = row_align if total_align is None else total_align
    blocks, sections, row = [], {}, 0
    for name, arr in entries:
        arr = jnp.asarray(arr, jnp.float32)
        k, n = int(arr.shape[0]), int(arr.shape[1])
        assert n <= width, (name, n, width)
        sections[name] = (row, k, n)
        if n < width:
            arr = jnp.concatenate(
                [arr, jnp.zeros((k, width - n), jnp.float32)], axis=1)
        blocks.append(arr)
        row += k
        pad = (-row) % row_align                 # keep sections row-aligned
        if pad:
            blocks.append(jnp.zeros((pad, width), jnp.float32))
            row += pad
    pad = (-row) % total_align
    if pad:
        blocks.append(jnp.zeros((pad, width), jnp.float32))
        row += pad
    return jnp.concatenate(blocks, axis=0).astype(dtype), sections


# ----------------------------------------------------------------------------
# one-time weight re-layout + packing (keep OUT of the per-step hot path)
# ----------------------------------------------------------------------------
def prepare_dqn_weights(params, *, task_shape, kernel_size=3):
    f32, bf16 = jnp.float32, jnp.bfloat16
    C, H, W = task_shape
    K = kernel_size
    OH, OW = H - K + 1, W - K + 1                 # stride = 1, VALID
    CKK = C * K * K
    CO = int(params["wc"].shape[0])               # hidden_size // 2
    HID = int(params["w1c"].shape[0])             # 32
    obs = int(params["win"].shape[1]) - HID
    H2 = int(params["wh2"].shape[0])              # 64
    a_dims = tuple(int(params[f"wo{i}"].shape[0]) for i in (1, 2, 3))
    OUT_W = LANES
    assert sum(a_dims) <= OUT_W
    assert OW * CO <= LANES        # TODO(synk): strip the conv weight too if wider
    assert LANES % HID == 0        # fc1 diag blocks must not straddle a strip

    # conv as one matmul: OW-block-diagonal weight, 1/255 input norm folded in.
    wc_flat = params["wc"].reshape(CO, CKK).T.astype(f32) * (1.0 / 255.0)
    wc_blk = jnp.kron(jnp.eye(OW, dtype=f32), wc_flat)            # (OW*CKK, OW*CO)
    bc_blk = jnp.tile(params["bc"].astype(f32), OW).reshape(1, OW * CO)

    # fc1 (CO*OH*OW -> HID) laid out to consume the conv output directly, split
    # into 128-lane column strips (no global-max-width padding).
    w1_wide = (params["w1c"].astype(f32).reshape(HID, CO, OH, OW)
               .transpose(3, 1, 2, 0).reshape(OW * CO, OH * HID))
    n_w1_strips = (OH * HID + LANES - 1) // LANES
    w1_strips = [(f"w1s{i}", w1_wide[:, i * LANES:min((i + 1) * LANES, OH * HID)])
                 for i in range(n_w1_strips)]

    main_entries = [("wc_blk", wc_blk)] + w1_strips + [
        ("w2c", params["w2c"].T),
        ("win_x", params["win"].T[:obs]),
        ("win_c", params["win"].T[obs:]),
        ("wh1", params["wh1"].T),      # shared by trunk and all three heads
        ("wh2", params["wh2"].T),
    ]
    slab_main, sec_main = _pack_slab(main_entries, bf16)

    # head-only weights (overlapped DMA): per-head first layers + zero-padded
    # output projections.  No block-diagonal wh1/wh2 copies any more.
    head_entries = []
    bo_pad = jnp.zeros((1, OUT_W), f32)
    off = 0
    for i, a in zip((1, 2, 3), a_dims):
        head_entries.append((f"wa{i}", params[f"wa{i}"].T))               # (64,128)
        wo = jnp.zeros((H2, OUT_W), f32).at[:, off:off + a].set(params[f"wo{i}"].T)
        head_entries.append((f"wo{i}", wo))                                # (64,128)
        bo_pad = bo_pad.at[0, off:off + a].set(params[f"bo{i}"].astype(f32))
        off += a
    slab_head, sec_head = _pack_slab(head_entries, bf16)

    # biases in a tiny separate f32 slab (no bf16 bias rounding).
    bias_entries = [
        ("bc_blk", bc_blk),
        ("b1c", params["b1c"].reshape(1, -1)),
        ("b2c", params["b2c"].reshape(1, -1)),
        ("b_in", params["bin"].reshape(1, -1)),
        ("bh1", params["bh1"].reshape(1, -1)),
        ("bh2", params["bh2"].reshape(1, -1)),
        ("ba1", params["ba1"].reshape(1, -1)),
        ("ba2", params["ba2"].reshape(1, -1)),
        ("ba3", params["ba3"].reshape(1, -1)),
        ("bo_pad", bo_pad),
    ]
    bias_slab, sec_bias = _pack_slab(bias_entries, f32, row_align=1, total_align=8)

    meta = dict(OH=OH, OW=OW, K=K, C=C, CKK=CKK, CO=CO, HID=HID, OUT_W=OUT_W,
                n_w1_strips=n_w1_strips, a_dims=a_dims,
                sec_main=sec_main, sec_head=sec_head, sec_bias=sec_bias)
    return dict(slab_main=slab_main, slab_head=slab_head, bias_slab=bias_slab,
                meta=meta)


# ----------------------------------------------------------------------------
# Pallas kernel: entire DQN forward (conv + CNN FCs + trunk + 3 heads)
# ----------------------------------------------------------------------------
def dqn_kernel(meta, x_ref, patches_ref, main_ref, bias_ref, head_hbm_ref,
               out_ref, head_vmem, head_sem):
    f32, bf16 = jnp.float32, jnp.bfloat16
    B, OH, HID = meta["B"], meta["OH"], meta["HID"]
    sec_m, sec_h, sec_b = meta["sec_main"], meta["sec_head"], meta["sec_bias"]

    # Start the head-weight DMA immediately so it overlaps conv/fc1/trunk work
    # (with no grid, the auto-VMEM inputs have already landed before the body).
    head_cp = pltpu.make_async_copy(head_hbm_ref, head_vmem, head_sem)
    head_cp.start()

    def view(ref, sec, name):                     # static ref slice, zero cost
        r, k, n = sec[name]
        return ref[r:r + k, 0:n]

    def wm(name):                                 # bf16 main-slab weight
        return view(main_ref, sec_m, name)

    def wh(name):                                 # bf16 head-slab weight (post-wait)
        return view(head_vmem, sec_h, name)

    def b(name):                                  # f32 (1, n) bias row
        return view(bias_ref, sec_b, name)

    def mm(a, wmat):                              # bf16 MXU matmul, f32 acc
        return jnp.dot(a.astype(bf16), wmat, preferred_element_type=f32)

    def relu(v):                                  # VPU math stays f32 (v5e-safe)
        return jnp.maximum(v, 0.0)

    # ---------------- CNNLayer ----------------
    # conv as one matmul: im2col rows are (oh, b), lanes (ow, c, kh, kw); the
    # OW-block-diagonal weight (1/255 folded in) yields (OH*B, OW*CO) directly.
    conv = relu(mm(patches_ref[...], wm("wc_blk")) + b("bc_blk"))    # (OH*B, OW*CO)

    # fc1 (Linear(CO*OH*OW -> HID)) as 128-lane column-strip matmuls; the useful
    # result is the sum of the per-oh diagonal blocks (pairwise-tree reduced).
    conv_bf = conv.astype(bf16)
    strips = [jnp.dot(conv_bf, wm(f"w1s{i}"), preferred_element_type=f32)
              for i in range(meta["n_w1_strips"])]
    blocks = []
    for oh in range(OH):                          # extract all slices up front
        s, off = divmod(oh * HID, LANES)
        blocks.append(strips[s][oh * B:(oh + 1) * B, off:off + HID])
    while len(blocks) > 1:                        # pairwise tree, depth ceil(log2)
        nxt = [blocks[i] + blocks[i + 1] for i in range(0, len(blocks) - 1, 2)]
        if len(blocks) % 2:
            nxt.append(blocks[-1])
        blocks = nxt
    hc = relu(blocks[0] + b("b1c"))                                  # (B, HID)
    hc = relu(mm(hc, wm("w2c")) + b("b2c"))                          # (B, HID)

    # ---------------- trunk ----------------
    # cat((x, cnn_out), -1) @ W_in == x @ W_in[:obs] + cnn_out @ W_in[obs:]
    x1 = relu(mm(x_ref[...], wm("win_x")) + mm(hc, wm("win_c")) + b("b_in"))
    x2 = relu(mm(x1, wm("wh1")) + b("bh1"))                          # (B, 64)
    x3 = relu(mm(x2, wm("wh2")) + b("bh2"))                          # (B, 64)

    # ---------------- heads ----------------
    # The heads share hidden1/hidden2 with the trunk (same slab sections); only
    # wa*/wo* come from the overlapped DMA, awaited just before use.
    head_cp.wait()
    q = None
    for i in (1, 2, 3):
        t1 = relu(mm(x3, wh(f"wa{i}")) + b(f"ba{i}"))                # (B, 128)
        t2 = relu(mm(t1, wm("wh1")) + b("bh1"))                      # (B, 64)
        t3 = relu(mm(t2, wm("wh2")) + b("bh2"))                      # (B, 64)
        qi = mm(t3, wh(f"wo{i}"))              # (B, 128): head-i lanes, rest zero
        q = qi if q is None else q + qi
    out_ref[...] = q + b("bo_pad")                                   # lane-dense store


# ----------------------------------------------------------------------------
# hot-path wrapper: im2col + pallas_call (weight packing is NOT repeated here)
# ----------------------------------------------------------------------------
def dqn_forward(x, task, slab_main, slab_head, bias_slab, *, meta):
    f32, bf16 = jnp.float32, jnp.bfloat16
    B = x.shape[0]
    C, K, OH, OW, CKK = meta["C"], meta["K"], meta["OH"], meta["OW"], meta["CKK"]
    OUT_W = meta["OUT_W"]
    a1, a2, a3 = meta["a_dims"]

    # im2col: rows = (oh, b), lanes = (ow, c, kh, kw).
    # TODO(synk): if task ever grows, build patches in-kernel from a VMEM copy of
    # `task` instead of materializing the ~K^2x expanded array through HBM.
    windows = jnp.stack(
        [jnp.stack([task[:, :, kh:kh + OH, kw:kw + OW] for kw in range(K)], axis=2)
         for kh in range(K)], axis=2)                      # (B, C, KH, KW, OH, OW)
    patches = (windows.transpose(4, 0, 5, 1, 2, 3)
               .reshape(OH * B, OW * CKK).astype(bf16))

    vmem = pl.BlockSpec(memory_space=pltpu.MemorySpace.VMEM)
    hbm = pl.BlockSpec(memory_space=pl.ANY)                # head slab: manual DMA
    q = pl.pallas_call(
        functools.partial(dqn_kernel, dict(meta, B=B)),
        out_shape=jax.ShapeDtypeStruct((B, OUT_W), f32),
        in_specs=[vmem, vmem, vmem, vmem, hbm],
        out_specs=vmem,
        scratch_shapes=[pltpu.VMEM(slab_head.shape, slab_head.dtype),
                        pltpu.SemaphoreType.DMA],
    )(x.astype(f32), patches, slab_main, bias_slab, slab_head)

    return q[:, :a1], q[:, a1:a1 + a2], q[:, a1 + a2:a1 + a2 + a3]


# ----------------------------------------------------------------------------
# pure-JAX reference matching the PyTorch forward exactly (f32)
# ----------------------------------------------------------------------------
def dqn_reference(x, task, params):
    f32 = jnp.float32
    t = task.astype(f32) / 255.0
    conv = lax.conv_general_dilated(t, params["wc"].astype(f32), (1, 1), "VALID",
                                    dimension_numbers=("NCHW", "OIHW", "NCHW"))
    conv = jnp.maximum(conv + params["bc"][None, :, None, None], 0.0)
    flat = conv.reshape(conv.shape[0], -1)                 # NCHW flatten
    h = jnp.maximum(flat @ params["w1c"].T + params["b1c"], 0.0)
    h = jnp.maximum(h @ params["w2c"].T + params["b2c"], 0.0)
    xin = jnp.concatenate([x.astype(f32), h], axis=-1)
    x1 = jnp.maximum(xin @ params["win"].T + params["bin"], 0.0)
    x2 = jnp.maximum(x1 @ params["wh1"].T + params["bh1"], 0.0)
    x3 = jnp.maximum(x2 @ params["wh2"].T + params["bh2"], 0.0)

    def head(i):
        t_ = jnp.maximum(x3 @ params[f"wa{i}"].T + params[f"ba{i}"], 0.0)
        t_ = jnp.maximum(t_ @ params["wh1"].T + params["bh1"], 0.0)
        t_ = jnp.maximum(t_ @ params["wh2"].T + params["bh2"], 0.0)
        return t_ @ params[f"wo{i}"].T + params[f"bo{i}"]

    return head(1), head(2), head(3)


if __name__ == "__main__":
    B = 2
    obs_dim = 16
    C, H, W = 4, 8, 8                 # task_dim = (channels, width, height)
    hidden_size = 32                  # CNNLayer hidden size (fixed by DQN.__init__)
    taskA, aimA, resA = 5, 4, 3       # action dims
    K = 3
    OH, OW = H - K + 1, W - K + 1
    CO = hidden_size // 2
    flat_dim = CO * OH * OW

    key = jax.random.PRNGKey(0)
    keys = iter(jax.random.split(key, 32))

    def nrm(shape, scale=0.1):
        return scale * jax.random.normal(next(keys), shape, jnp.float32)

    # Deterministic synthetic parameters, PyTorch layout (out_features, in_features).
    params = {
        "wc": nrm((CO, C, K, K)),            "bc": nrm((CO,), 0.01),
        "w1c": nrm((hidden_size, flat_dim)), "b1c": nrm((hidden_size,), 0.01),
        "w2c": nrm((hidden_size, hidden_size)), "b2c": nrm((hidden_size,), 0.01),
        "win": nrm((128, obs_dim + hidden_size)), "bin": nrm((128,), 0.01),
        "wh1": nrm((64, 128)), "bh1": nrm((64,), 0.01),
        "wh2": nrm((64, 64)),  "bh2": nrm((64,), 0.01),
    }
    for i, a in zip((1, 2, 3), (taskA, aimA, resA)):
        params[f"wa{i}"] = nrm((128, 64)); params[f"ba{i}"] = nrm((128,), 0.01)
        params[f"wo{i}"] = nrm((a, 64));   params[f"bo{i}"] = nrm((a,), 0.01)

    kx, kt = jax.random.split(next(keys))
    x = jax.random.normal(kx, (B, obs_dim), jnp.float32)
    task = jax.random.uniform(kt, (B, C, H, W), jnp.float32, 0.0, 255.0)

    # One-time packing (cold path), then the jitted hot path.
    packed = prepare_dqn_weights(params, task_shape=(C, H, W), kernel_size=K)
    fwd = jax.jit(functools.partial(dqn_forward, meta=packed["meta"]))
    outs = jax.block_until_ready(
        fwd(x, task, packed["slab_main"], packed["slab_head"], packed["bias_slab"]))

    refs = dqn_reference(x, task, params)
    # Biases are f32 now (tighter numerics than before); remaining tolerance is
    # for the bf16 MXU weight operands (accumulation stays f32).
    for o, r in zip(outs, refs):
        np.testing.assert_allclose(np.asarray(o), np.asarray(r), rtol=2e-2, atol=5e-3)

    print("KERNEL_OK")
</pallas_src>

<mosaic_0001>
module attributes {stable_mosaic.version = 11 : i64} {
  func.func @dqn_kernel(%arg0: memref<2x16xf32, #tpu.memory_space<vmem>>, %arg1: memref<12x216xbf16, #tpu.memory_space<vmem>>, %arg2: memref<688x128xbf16, #tpu.memory_space<vmem>>, %arg3: memref<16x128xf32, #tpu.memory_space<vmem>>, %arg4: memref<384x128xbf16, #tpu.memory_space<any>>, %arg5: memref<2x128xf32, #tpu.memory_space<vmem>>, %arg6: memref<384x128xbf16, #tpu.memory_space<vmem>>, %arg7: memref<!tpu.dma_semaphore, #tpu.memory_space<semaphore_mem>>) attributes {dimension_semantics = [], scalar_prefetch = 0 : i64, scratch_operands = 2 : i64, tpu.core_type = #tpu.core_type<tc>} {
    tpu.enqueue_dma source(%arg4 : memref<384x128xbf16, #tpu.memory_space<any>>) target(%arg6 : memref<384x128xbf16, #tpu.memory_space<vmem>>) target_semaphore(%arg7 : memref<!tpu.dma_semaphore, #tpu.memory_space<semaphore_mem>>)
    %c0 = arith.constant 0 : index
    %c0_0 = arith.constant 0 : index
    %0 = vector.load %arg1[%c0, %c0_0] : memref<12x216xbf16, #tpu.memory_space<vmem>>, vector<12x216xbf16>
    %c0_1 = arith.constant 0 : index
    %c0_2 = arith.constant 0 : index
    %1 = vector.load %arg2[%c0_1, %c0_2] : memref<688x128xbf16, #tpu.memory_space<vmem>>, vector<216x96xbf16>
    %cst = arith.constant dense<0.000000e+00> : vector<12x96xf32>
    %2 = tpu.matmul %0, %1, %cst {dimension_numbers = #tpu.dot_dimension_numbers<[1], [0], [0], [1], [0, 0, 1, 1], [], []>} : vector<12x216xbf16>, vector<216x96xbf16>, vector<12x96xf32> -> vector<12x96xf32>
    %c0_3 = arith.constant 0 : index
    %c0_4 = arith.constant 0 : index
    %3 = vector.load %arg3[%c0_3, %c0_4] : memref<16x128xf32, #tpu.memory_space<vmem>>, vector<1x96xf32>
    %4 = vector.broadcast %3 : vector<1x96xf32> to vector<12x96xf32>
    %5 = arith.addf %2, %4 : vector<12x96xf32>
    %cst_5 = arith.constant 0.000000e+00 : f32
    %6 = vector.broadcast %cst_5 : f32 to vector<12x96xf32>
    %7 = arith.maximumf %5, %6 : vector<12x96xf32>
    %8 = arith.truncf %7 : vector<12x96xf32> to vector<12x96xbf16>
    %c224 = arith.constant 224 : index
    %c0_6 = arith.constant 0 : index
    %9 = vector.load %arg2[%c224, %c0_6] : memref<688x128xbf16, #tpu.memory_space<vmem>>, vector<96x128xbf16>
    %cst_7 = arith.constant dense<0.000000e+00> : vector<12x128xf32>
    %10 = tpu.matmul %8, %9, %cst_7 {dimension_numbers = #tpu.dot_dimension_numbers<[1], [0], [0], [1], [0, 0, 1, 1], [], []>} : vector<12x96xbf16>, vector<96x128xbf16>, vector<12x128xf32> -> vector<12x128xf32>
    %c320 = arith.constant 320 : index
    %c0_8 = arith.constant 0 : index
    %11 = vector.load %arg2[%c320, %c0_8] : memref<688x128xbf16, #tpu.memory_space<vmem>>, vector<96x64xbf16>
    %cst_9 = arith.constant dense<0.000000e+00> : vector<12x64xf32>
    %12 = tpu.matmul %8, %11, %cst_9 {dimension_numbers = #tpu.dot_dimension_numbers<[1], [0], [0], [1], [0, 0, 1, 1], [], []>} : vector<12x96xbf16>, vector<96x64xbf16>, vector<12x64xf32> -> vector<12x64xf32>
    %13 = vector.extract_strided_slice %10 {offsets = [0, 0], sizes = [2, 32], strides = [1, 1]} : vector<12x128xf32> to vector<2x32xf32>
    %14 = vector.extract_strided_slice %10 {offsets = [2, 32], sizes = [2, 32], strides = [1, 1]} : vector<12x128xf32> to vector<2x32xf32>
    %15 = vector.extract_strided_slice %10 {offsets = [4, 64], sizes = [2, 32], strides = [1, 1]} : vector<12x128xf32> to vector<2x32xf32>
    %16 = vector.extract_strided_slice %10 {offsets = [6, 96], sizes = [2, 32], strides = [1, 1]} : vector<12x128xf32> to vector<2x32xf32>
    %17 = vector.extract_strided_slice %12 {offsets = [8, 0], sizes = [2, 32], strides = [1, 1]} : vector<12x64xf32> to vector<2x32xf32>
    %18 = vector.extract_strided_slice %12 {offsets = [10, 32], sizes = [2, 32], strides = [1, 1]} : vector<12x64xf32> to vector<2x32xf32>
    %19 = arith.addf %13, %14 : vector<2x32xf32>
    %20 = arith.addf %15, %16 : vector<2x32xf32>
    %21 = arith.addf %17, %18 : vector<2x32xf32>
    %22 = arith.addf %19, %20 : vector<2x32xf32>
    %23 = arith.addf %22, %21 : vector<2x32xf32>
    %c1 = arith.constant 1 : index
    %c0_10 = arith.constant 0 : index
    %24 = vector.load %arg3[%c1, %c0_10] : memref<16x128xf32, #tpu.memory_space<vmem>>, vector<1x32xf32>
    %25 = vector.broadcast %24 : vector<1x32xf32> to vector<2x32xf32>
    %26 = arith.addf %23, %25 : vector<2x32xf32>
    %cst_11 = arith.constant 0.000000e+00 : f32
    %27 = vector.broadcast %cst_11 : f32 to vector<2x32xf32>
    %28 = arith.maximumf %26, %27 : vector<2x32xf32>
    %c416 = arith.constant 416 : index
    %c0_12 = arith.constant 0 : index
    %29 = vector.load %arg2[%c416, %c0_12] : memref<688x128xbf16, #tpu.memory_space<vmem>>, vector<32x32xbf16>
    %30 = arith.truncf %28 : vector<2x32xf32> to vector<2x32xbf16>
    %cst_13 = arith.constant dense<0.000000e+00> : vector<2x32xf32>
    %31 = tpu.matmul %30, %29, %cst_13 {dimension_numbers = #tpu.dot_dimension_numbers<[1], [0], [0], [1], [0, 0, 1, 1], [], []>} : vector<2x32xbf16>, vector<32x32xbf16>, vector<2x32xf32> -> vector<2x32xf32>
    %c2 = arith.constant 2 : index
    %c0_14 = arith.constant 0 : index
    %32 = vector.load %arg3[%c2, %c0_14] : memref<16x128xf32, #tpu.memory_space<vmem>>, vector<1x32xf32>
    %33 = vector.broadcast %32 : vector<1x32xf32> to vector<2x32xf32>
    %34 = arith.addf %31, %33 : vector<2x32xf32>
    %cst_15 = arith.constant 0.000000e+00 : f32
    %35 = vector.broadcast %cst_15 : f32 to vector<2x32xf32>
    %36 = arith.maximumf %34, %35 : vector<2x32xf32>
    %c0_16 = arith.constant 0 : index
    %c0_17 = arith.constant 0 : index
    %37 = vector.load %arg0[%c0_16, %c0_17] : memref<2x16xf32, #tpu.memory_space<vmem>>, vector<2x16xf32>
    %c448 = arith.constant 448 : index
    %c0_18 = arith.constant 0 : index
    %38 = vector.load %arg2[%c448, %c0_18] : memref<688x128xbf16, #tpu.memory_space<vmem>>, vector<16x128xbf16>
    %39 = arith.truncf %37 : vector<2x16xf32> to vector<2x16xbf16>
    %cst_19 = arith.constant dense<0.000000e+00> : vector<2x128xf32>
    %40 = tpu.matmul %39, %38, %cst_19 {dimension_numbers = #tpu.dot_dimension_numbers<[1], [0], [0], [1], [0, 0, 1, 1], [], []>} : vector<2x16xbf16>, vector<16x128xbf16>, vector<2x128xf32> -> vector<2x128xf32>
    %c464 = arith.constant 464 : index
    %c0_20 = arith.constant 0 : index
    %41 = vector.load %arg2[%c464, %c0_20] : memref<688x128xbf16, #tpu.memory_space<vmem>>, vector<32x128xbf16>
    %42 = arith.truncf %36 : vector<2x32xf32> to vector<2x32xbf16>
    %cst_21 = arith.constant dense<0.000000e+00> : vector<2x128xf32>
    %43 = tpu.matmul %42, %41, %cst_21 {dimension_numbers = #tpu.dot_dimension_numbers<[1], [0], [0], [1], [0, 0, 1, 1], [], []>} : vector<2x32xbf16>, vector<32x128xbf16>, vector<2x128xf32> -> vector<2x128xf32>
    %44 = arith.addf %40, %43 : vector<2x128xf32>
    %c3 = arith.constant 3 : index
    %c0_22 = arith.constant 0 : index
    %45 = vector.load %arg3[%c3, %c0_22] : memref<16x128xf32, #tpu.memory_space<vmem>>, vector<1x128xf32>
    %46 = vector.broadcast %45 : vector<1x128xf32> to vector<2x128xf32>
    %47 = arith.addf %44, %46 : vector<2x128xf32>
    %cst_23 = arith.constant 0.000000e+00 : f32
    %48 = vector.broadcast %cst_23 : f32 to vector<2x128xf32>
    %49 = arith.maximumf %47, %48 : vector<2x128xf32>
    %c496 = arith.constant 496 : index
    %c0_24 = arith.constant 0 : index
    %50 = vector.load %arg2[%c496, %c0_24] : memref<688x128xbf16, #tpu.memory_space<vmem>>, vector<128x64xbf16>
    %51 = arith.truncf %49 : vector<2x128xf32> to vector<2x128xbf16>
    %cst_25 = arith.constant dense<0.000000e+00> : vector<2x64xf32>
    %52 = tpu.matmul %51, %50, %cst_25 {dimension_numbers = #tpu.dot_dimension_numbers<[1], [0], [0], [1], [0, 0, 1, 1], [], []>} : vector<2x128xbf16>, vector<128x64xbf16>, vector<2x64xf32> -> vector<2x64xf32>
    %c4 = arith.constant 4 : index
    %c0_26 = arith.constant 0 : index
    %53 = vector.load %arg3[%c4, %c0_26] : memref<16x128xf32, #tpu.memory_space<vmem>>, vector<1x64xf32>
    %54 = vector.broadcast %53 : vector<1x64xf32> to vector<2x64xf32>
    %55 = arith.addf %52, %54 : vector<2x64xf32>
    %cst_27 = arith.constant 0.000000e+00 : f32
    %56 = vector.broadcast %cst_27 : f32 to vector<2x64xf32>
    %57 = arith.maximumf %55, %56 : vector<2x64xf32>
    %c624 = arith.constant 624 : index
    %c0_28 = arith.constant 0 : index
    %58 = vector.load %arg2[%c624, %c0_28] : memref<688x128xbf16, #tpu.memory_space<vmem>>, vector<64x64xbf16>
    %59 = arith.truncf %57 : vector<2x64xf32> to vector<2x64xbf16>
    %cst_29 = arith.constant dense<0.000000e+00> : vector<2x64xf32>
    %60 = tpu.matmul %59, %58, %cst_29 {dimension_numbers = #tpu.dot_dimension_numbers<[1], [0], [0], [1], [0, 0, 1, 1], [], []>} : vector<2x64xbf16>, vector<64x64xbf16>, vector<2x64xf32> -> vector<2x64xf32>
    %c5 = arith.constant 5 : index
    %c0_30 = arith.constant 0 : index
    %61 = vector.load %arg3[%c5, %c0_30] : memref<16x128xf32, #tpu.memory_space<vmem>>, vector<1x64xf32>
    %62 = vector.broadcast %61 : vector<1x64xf32> to vector<2x64xf32>
    %63 = arith.addf %60, %62 : vector<2x64xf32>
    %cst_31 = arith.constant 0.000000e+00 : f32
    %64 = vector.broadcast %cst_31 : f32 to vector<2x64xf32>
    %65 = arith.maximumf %63, %64 : vector<2x64xf32>
    tpu.wait_dma2 semaphore(%arg7 : memref<!tpu.dma_semaphore, #tpu.memory_space<semaphore_mem>>) src(%arg4 : memref<384x128xbf16, #tpu.memory_space<any>>) dst(%arg6 : memref<384x128xbf16, #tpu.memory_space<vmem>>)
    %c0_32 = arith.constant 0 : index
    %c0_33 = arith.constant 0 : index
    %66 = vector.load %arg6[%c0_32, %c0_33] : memref<384x128xbf16, #tpu.memory_space<vmem>>, vector<64x128xbf16>
    %67 = arith.truncf %65 : vector<2x64xf32> to vector<2x64xbf16>
    %cst_34 = arith.constant dense<0.000000e+00> : vector<2x128xf32>
    %68 = tpu.matmul %67, %66, %cst_34 {dimension_numbers = #tpu.dot_dimension_numbers<[1], [0], [0], [1], [0, 0, 1, 1], [], []>} : vector<2x64xbf16>, vector<64x128xbf16>, vector<2x128xf32> -> vector<2x128xf32>
    %c6 = arith.constant 6 : index
    %c0_35 = arith.constant 0 : index
    %69 = vector.load %arg3[%c6, %c0_35] : memref<16x128xf32, #tpu.memory_space<vmem>>, vector<1x128xf32>
    %70 = vector.broadcast %69 : vector<1x128xf32> to vector<2x128xf32>
    %71 = arith.addf %68, %70 : vector<2x128xf32>
    %cst_36 = arith.constant 0.000000e+00 : f32
    %72 = vector.broadcast %cst_36 : f32 to vector<2x128xf32>
    %73 = arith.maximumf %71, %72 : vector<2x128xf32>
    %c496_37 = arith.constant 496 : index
    %c0_38 = arith.constant 0 : index
    %74 = vector.load %arg2[%c496_37, %c0_38] : memref<688x128xbf16, #tpu.memory_space<vmem>>, vector<128x64xbf16>
    %75 = arith.truncf %73 : vector<2x128xf32> to vector<2x128xbf16>
    %cst_39 = arith.constant dense<0.000000e+00> : vector<2x64xf32>
    %76 = tpu.matmul %75, %74, %cst_39 {dimension_numbers = #tpu.dot_dimension_numbers<[1], [0], [0], [1], [0, 0, 1, 1], [], []>} : vector<2x128xbf16>, vector<128x64xbf16>, vector<2x64xf32> -> vector<2x64xf32>
    %c4_40 = arith.constant 4 : index
    %c0_41 = arith.constant 0 : index
    %77 = vector.load %arg3[%c4_40, %c0_41] : memref<16x128xf32, #tpu.memory_space<vmem>>, vector<1x64xf32>
    %78 = vector.broadcast %77 : vector<1x64xf32> to vector<2x64xf32>
    %79 = arith.addf %76, %78 : vector<2x64xf32>
    %cst_42 = arith.constant 0.000000e+00 : f32
    %80 = vector.broadcast %cst_42 : f32 to vector<2x64xf32>
    %81 = arith.maximumf %79, %80 : vector<2x64xf32>
    %c624_43 = arith.constant 624 : index
    %c0_44 = arith.constant 0 : index
    %82 = vector.load %arg2[%c624_43, %c0_44] : memref<688x128xbf16, #tpu.memory_space<vmem>>, vector<64x64xbf16>
    %83 = arith.truncf %81 : vector<2x64xf32> to vector<2x64xbf16>
    %cst_45 = arith.constant dense<0.000000e+00> : vector<2x64xf32>
    %84 = tpu.matmul %83, %82, %cst_45 {dimension_numbers = #tpu.dot_dimension_numbers<[1], [0], [0], [1], [0, 0, 1, 1], [], []>} : vector<2x64xbf16>, vector<64x64xbf16>, vector<2x64xf32> -> vector<2x64xf32>
    %c5_46 = arith.constant 5 : index
    %c0_47 = arith.constant 0 : index
    %85 = vector.load %arg3[%c5_46, %c0_47] : memref<16x128xf32, #tpu.memory_space<vmem>>, vector<1x64xf32>
    %86 = vector.broadcast %85 : vector<1x64xf32> to vector<2x64xf32>
    %87 = arith.addf %84, %86 : vector<2x64xf32>
    %cst_48 = arith.constant 0.000000e+00 : f32
    %88 = vector.broadcast %cst_48 : f32 to vector<2x64xf32>
    %89 = arith.maximumf %87, %88 : vector<2x64xf32>
    %c64 = arith.constant 64 : index
    %c0_49 = arith.constant 0 : index
    %90 = vector.load %arg6[%c64, %c0_49] : memref<384x128xbf16, #tpu.memory_space<vmem>>, vector<64x128xbf16>
    %91 = arith.truncf %89 : vector<2x64xf32> to vector<2x64xbf16>
    %cst_50 = arith.constant dense<0.000000e+00> : vector<2x128xf32>
    %92 = tpu.matmul %91, %90, %cst_50 {dimension_numbers = #tpu.dot_dimension_numbers<[1], [0], [0], [1], [0, 0, 1, 1], [], []>} : vector<2x64xbf16>, vector<64x128xbf16>, vector<2x128xf32> -> vector<2x128xf32>
    %c128 = arith.constant 128 : index
    %c0_51 = arith.constant 0 : index
    %93 = vector.load %arg6[%c128, %c0_51] : memref<384x128xbf16, #tpu.memory_space<vmem>>, vector<64x128xbf16>
    %94 = arith.truncf %65 : vector<2x64xf32> to vector<2x64xbf16>
    %cst_52 = arith.constant dense<0.000000e+00> : vector<2x128xf32>
    %95 = tpu.matmul %94, %93, %cst_52 {dimension_numbers = #tpu.dot_dimension_numbers<[1], [0], [0], [1], [0, 0, 1, 1], [], []>} : vector<2x64xbf16>, vector<64x128xbf16>, vector<2x128xf32> -> vector<2x128xf32>
    %c7 = arith.constant 7 : index
    %c0_53 = arith.constant 0 : index
    %96 = vector.load %arg3[%c7, %c0_53] : memref<16x128xf32, #tpu.memory_space<vmem>>, vector<1x128xf32>
    %97 = vector.broadcast %96 : vector<1x128xf32> to vector<2x128xf32>
    %98 = arith.addf %95, %97 : vector<2x128xf32>
    %cst_54 = arith.constant 0.000000e+00 : f32
    %99 = vector.broadcast %cst_54 : f32 to vector<2x128xf32>
    %100 = arith.maximumf %98, %99 : vector<2x128xf32>
    %c496_55 = arith.constant 496 : index
    %c0_56 = arith.constant 0 : index
    %101 = vector.load %arg2[%c496_55, %c0_56] : memref<688x128xbf16, #tpu.memory_space<vmem>>, vector<128x64xbf16>
    %102 = arith.truncf %100 : vector<2x128xf32> to vector<2x128xbf16>
    %cst_57 = arith.constant dense<0.000000e+00> : vector<2x64xf32>
    %103 = tpu.matmul %102, %101, %cst_57 {dimension_numbers = #tpu.dot_dimension_numbers<[1], [0], [0], [1], [0, 0, 1, 1], [], []>} : vector<2x128xbf16>, vector<128x64xbf16>, vector<2x64xf32> -> vector<2x64xf32>
    %c4_58 = arith.constant 4 : index
    %c0_59 = arith.constant 0 : index
    %104 = vector.load %arg3[%c4_58, %c0_59] : memref<16x128xf32, #tpu.memory_space<vmem>>, vector<1x64xf32>
    %105 = vector.broadcast %104 : vector<1x64xf32> to vector<2x64xf32>
    %106 = arith.addf %103, %105 : vector<2x64xf32>
    %cst_60 = arith.constant 0.000000e+00 : f32
    %107 = vector.broadcast %cst_60 : f32 to vector<2x64xf32>
    %108 = arith.maximumf %106, %107 : vector<2x64xf32>
    %c624_61 = arith.constant 624 : index
    %c0_62 = arith.constant 0 : index
    %109 = vector.load %arg2[%c624_61, %c0_62] : memref<688x128xbf16, #tpu.memory_space<vmem>>, vector<64x64xbf16>
    %110 = arith.truncf %108 : vector<2x64xf32> to vector<2x64xbf16>
    %cst_63 = arith.constant dense<0.000000e+00> : vector<2x64xf32>
    %111 = tpu.matmul %110, %109, %cst_63 {dimension_numbers = #tpu.dot_dimension_numbers<[1], [0], [0], [1], [0, 0, 1, 1], [], []>} : vector<2x64xbf16>, vector<64x64xbf16>, vector<2x64xf32> -> vector<2x64xf32>
    %c5_64 = arith.constant 5 : index
    %c0_65 = arith.constant 0 : index
    %112 = vector.load %arg3[%c5_64, %c0_65] : memref<16x128xf32, #tpu.memory_space<vmem>>, vector<1x64xf32>
    %113 = vector.broadcast %112 : vector<1x64xf32> to vector<2x64xf32>
    %114 = arith.addf %111, %113 : vector<2x64xf32>
    %cst_66 = arith.constant 0.000000e+00 : f32
    %115 = vector.broadcast %cst_66 : f32 to vector<2x64xf32>
    %116 = arith.maximumf %114, %115 : vector<2x64xf32>
    %c192 = arith.constant 192 : index
    %c0_67 = arith.constant 0 : index
    %117 = vector.load %arg6[%c192, %c0_67] : memref<384x128xbf16, #tpu.memory_space<vmem>>, vector<64x128xbf16>
    %118 = arith.truncf %116 : vector<2x64xf32> to vector<2x64xbf16>
    %cst_68 = arith.constant dense<0.000000e+00> : vector<2x128xf32>
    %119 = tpu.matmul %118, %117, %cst_68 {dimension_numbers = #tpu.dot_dimension_numbers<[1], [0], [0], [1], [0, 0, 1, 1], [], []>} : vector<2x64xbf16>, vector<64x128xbf16>, vector<2x128xf32> -> vector<2x128xf32>
    %120 = arith.addf %92, %119 : vector<2x128xf32>
    %c256 = arith.constant 256 : index
    %c0_69 = arith.constant 0 : index
    %121 = vector.load %arg6[%c256, %c0_69] : memref<384x128xbf16, #tpu.memory_space<vmem>>, vector<64x128xbf16>
    %122 = arith.truncf %65 : vector<2x64xf32> to vector<2x64xbf16>
    %cst_70 = arith.constant dense<0.000000e+00> : vector<2x128xf32>
    %123 = tpu.matmul %122, %121, %cst_70 {dimension_numbers = #tpu.dot_dimension_numbers<[1], [0], [0], [1], [0, 0, 1, 1], [], []>} : vector<2x64xbf16>, vector<64x128xbf16>, vector<2x128xf32> -> vector<2x128xf32>
    %c8 = arith.constant 8 : index
    %c0_71 = arith.constant 0 : index
    %124 = vector.load %arg3[%c8, %c0_71] : memref<16x128xf32, #tpu.memory_space<vmem>>, vector<1x128xf32>
    %125 = vector.broadcast %124 : vector<1x128xf32> to vector<2x128xf32>
    %126 = arith.addf %123, %125 : vector<2x128xf32>
    %cst_72 = arith.constant 0.000000e+00 : f32
    %127 = vector.broadcast %cst_72 : f32 to vector<2x128xf32>
    %128 = arith.maximumf %126, %127 : vector<2x128xf32>
    %c496_73 = arith.constant 496 : index
    %c0_74 = arith.constant 0 : index
    %129 = vector.load %arg2[%c496_73, %c0_74] : memref<688x128xbf16, #tpu.memory_space<vmem>>, vector<128x64xbf16>
    %130 = arith.truncf %128 : vector<2x128xf32> to vector<2x128xbf16>
    %cst_75 = arith.constant dense<0.000000e+00> : vector<2x64xf32>
    %131 = tpu.matmul %130, %129, %cst_75 {dimension_numbers = #tpu.dot_dimension_numbers<[1], [0], [0], [1], [0, 0, 1, 1], [], []>} : vector<2x128xbf16>, vector<128x64xbf16>, vector<2x64xf32> -> vector<2x64xf32>
    %c4_76 = arith.constant 4 : index
    %c0_77 = arith.constant 0 : index
    %132 = vector.load %arg3[%c4_76, %c0_77] : memref<16x128xf32, #tpu.memory_space<vmem>>, vector<1x64xf32>
    %133 = vector.broadcast %132 : vector<1x64xf32> to vector<2x64xf32>
    %134 = arith.addf %131, %133 : vector<2x64xf32>
    %cst_78 = arith.constant 0.000000e+00 : f32
    %135 = vector.broadcast %cst_78 : f32 to vector<2x64xf32>
    %136 = arith.maximumf %134, %135 : vector<2x64xf32>
    %c624_79 = arith.constant 624 : index
    %c0_80 = arith.constant 0 : index
    %137 = vector.load %arg2[%c624_79, %c0_80] : memref<688x128xbf16, #tpu.memory_space<vmem>>, vector<64x64xbf16>
    %138 = arith.truncf %136 : vector<2x64xf32> to vector<2x64xbf16>
    %cst_81 = arith.constant dense<0.000000e+00> : vector<2x64xf32>
    %139 = tpu.matmul %138, %137, %cst_81 {dimension_numbers = #tpu.dot_dimension_numbers<[1], [0], [0], [1], [0, 0, 1, 1], [], []>} : vector<2x64xbf16>, vector<64x64xbf16>, vector<2x64xf32> -> vector<2x64xf32>
    %c5_82 = arith.constant 5 : index
    %c0_83 = arith.constant 0 : index
    %140 = vector.load %arg3[%c5_82, %c0_83] : memref<16x128xf32, #tpu.memory_space<vmem>>, vector<1x64xf32>
    %141 = vector.broadcast %140 : vector<1x64xf32> to vector<2x64xf32>
    %142 = arith.addf %139, %141 : vector<2x64xf32>
    %cst_84 = arith.constant 0.000000e+00 : f32
    %143 = vector.broadcast %cst_84 : f32 to vector<2x64xf32>
    %144 = arith.maximumf %142, %143 : vector<2x64xf32>
    %c320_85 = arith.constant 320 : index
    %c0_86 = arith.constant 0 : index
    %145 = vector.load %arg6[%c320_85, %c0_86] : memref<384x128xbf16, #tpu.memory_space<vmem>>, vector<64x128xbf16>
    %146 = arith.truncf %144 : vector<2x64xf32> to vector<2x64xbf16>
    %cst_87 = arith.constant dense<0.000000e+00> : vector<2x128xf32>
    %147 = tpu.matmul %146, %145, %cst_87 {dimension_numbers = #tpu.dot_dimension_numbers<[1], [0], [0], [1], [0, 0, 1, 1], [], []>} : vector<2x64xbf16>, vector<64x128xbf16>, vector<2x128xf32> -> vector<2x128xf32>
    %148 = arith.addf %120, %147 : vector<2x128xf32>
    %c9 = arith.constant 9 : index
    %c0_88 = arith.constant 0 : index
    %149 = vector.load %arg3[%c9, %c0_88] : memref<16x128xf32, #tpu.memory_space<vmem>>, vector<1x128xf32>
    %150 = vector.broadcast %149 : vector<1x128xf32> to vector<2x128xf32>
    %151 = arith.addf %148, %150 : vector<2x128xf32>
    %c0_89 = arith.constant 0 : index
    %c0_90 = arith.constant 0 : index
    %152 = vector.load %arg5[%c0_89, %c0_90] : memref<2x128xf32, #tpu.memory_space<vmem>>, vector<2x128xf32>
    tpu.vector_store %arg5[%c0_89, %c0_90], %151 {strides = array<i32>} : memref<2x128xf32, #tpu.memory_space<vmem>>, vector<2x128xf32>,
    return
  }
}

</mosaic_0001>

<bundles_post_ra>
// kernel: dqn_forward.1
= control target key start
LH: loop header
LB: loop body
LE: loop exit
PB: predicated region body
PF: predicated region fallthrough
CT: control target
= control target key end

     0   :  { %s1967_s0 = inlined_call_operand.vmem [shape: f32[2,16], index: 0, kind: input, shape index: {}]   ;;  %s1968_s1 = inlined_call_operand.vmem [shape: bf16[12,216], index: 1, kind: input, shape index: {}]   ;;  %s1969_s2 = inlined_call_operand.vmem [shape: bf16[688,128], index: 2, kind: input, shape index: {}]   ;;  %s1970_s3 = inlined_call_operand.vmem [shape: f32[16,128], index: 3, kind: input, shape index: {}]   ;;  %s1971_s4 = inlined_call_operand.vmem [shape: bf16[384,128], index: 4, kind: input, shape index: {}]   ;;  %s1972_s5 = inlined_call_operand.vmem [shape: f32[2,128], index: 5, kind: output, shape index: {}]  }
   0x1   :  { %v29_v0 = vld [vmem:[%s1971_s4] sm:$0xff]  ;;  %v31_v1 = vld [vmem:[%s1971_s4 + $0x8] sm:$0xff]  ;;  %v33_v2 = vld [vmem:[%s1971_s4 + $0x10] sm:$0xff] }
   0x2   :  { %30 = vst [vmem:[#allocation2 + $0xb0] sm:$0xff] %v29_v0  ;;  %v35_v3 = vld [vmem:[%s1971_s4 + $0x18] sm:$0xff]  ;;  %v37_v4 = vld [vmem:[%s1971_s4 + $0x20] sm:$0xff]  ;;  %v39_v5 = vld [vmem:[%s1971_s4 + $0x28] sm:$0xff] }
   0x3   :  { %32 = vst [vmem:[#allocation2] sm:$0xff] %v31_v1  ;;  %v41_v6 = vld [vmem:[%s1971_s4 + $0x30] sm:$0xff]  ;;  %v43_v7 = vld [vmem:[%s1971_s4 + $0x38] sm:$0xff]  ;;  %v45_v8 = vld [vmem:[%s1971_s4 + $0x40] sm:$0xff] }
   0x4   :  { %34 = vst [vmem:[#allocation2 + $0x10] sm:$0xff] %v33_v2  ;;  %v47_v9 = vld [vmem:[%s1971_s4 + $0x48] sm:$0xff]  ;;  %v49_v10 = vld [vmem:[%s1971_s4 + $0x50] sm:$0xff]  ;;  %v51_v11 = vld [vmem:[%s1971_s4 + $0x58] sm:$0xff] }
   0x5   :  { %36 = vst [vmem:[#allocation2 + $0x48] sm:$0xff] %v35_v3  ;;  %v53_v12 = vld [vmem:[%s1971_s4 + $0x60] sm:$0xff]  ;;  %v55_v13 = vld [vmem:[%s1971_s4 + $0x68] sm:$0xff]  ;;  %v57_v14 = vld [vmem:[%s1971_s4 + $0x70] sm:$0xff] }
   0x6   :  { %38 = vst [vmem:[#allocation2 + $0x60] sm:$0xff] %v37_v4  ;;  %v59_v15 = vld [vmem:[%s1971_s4 + $0x78] sm:$0xff]  ;;  %v61_v16 = vld [vmem:[%s1971_s4 + $0x80] sm:$0xff]  ;;  %v63_v17 = vld [vmem:[%s1971_s4 + $0x88] sm:$0xff] }
   0x7   :  { %40 = vst [vmem:[#allocation2 + $0x28] sm:$0xff] %v39_v5  ;;  %v65_v18 = vld [vmem:[%s1971_s4 + $0x90] sm:$0xff]  ;;  %v67_v19 = vld [vmem:[%s1971_s4 + $0x98] sm:$0xff]  ;;  %v69_v20 = vld [vmem:[%s1971_s4 + $0xa0] sm:$0xff] }
   0x8   :  { %42 = vst [vmem:[#allocation2 + $0x40] sm:$0xff] %v41_v6  ;;  %v71_v21 = vld [vmem:[%s1971_s4 + $0xa8] sm:$0xff]  ;;  %v73_v22 = vld [vmem:[%s1971_s4 + $0xb0] sm:$0xff]  ;;  %v75_v23 = vld [vmem:[%s1971_s4 + $0xb8] sm:$0xff] }
   0x9   :  { %44 = vst [vmem:[#allocation2 + $0x78] sm:$0xff] %v43_v7 }
   0xa   :  { %46 = vst [vmem:[#allocation2 + $0x88] sm:$0xff] %v45_v8 }
   0xb   :  { %48 = vst [vmem:[#allocation2 + $0x90] sm:$0xff] %v47_v9 }
   0xc   :  { %50 = vst [vmem:[#allocation2 + $0x18] sm:$0xff] %v49_v10 }
   0xd   :  { %52 = vst [vmem:[#allocation2 + $0x98] sm:$0xff] %v51_v11 }
   0xe   :  { %54 = vst [vmem:[#allocation2 + $0x38] sm:$0xff] %v53_v12 }
   0xf   :  { %56 = vst [vmem:[#allocation2 + $0x50] sm:$0xff] %v55_v13 }
  0x10   :  { %58 = vst [vmem:[#allocation2 + $0x70] sm:$0xff] %v57_v14 }
  0x11   :  { %60 = vst [vmem:[#allocation2 + $0xa0] sm:$0xff] %v59_v15 }
  0x12   :  { %62 = vst [vmem:[#allocation2 + $0xa8] sm:$0xff] %v61_v16 }
  0x13   :  { %64 = vst [vmem:[#allocation2 + $0x68] sm:$0xff] %v63_v17 }
  0x14   :  { %66 = vst [vmem:[#allocation2 + $0x30] sm:$0xff] %v65_v18 }
  0x15   :  { %68 = vst [vmem:[#allocation2 + $0x58] sm:$0xff] %v67_v19 }
  0x16   :  { %70 = vst [vmem:[#allocation2 + $0x80] sm:$0xff] %v69_v20 }
  0x17   :  { %72 = vst [vmem:[#allocation2 + $0xb8] sm:$0xff] %v71_v21 }
  0x18   :  { %74 = vst [vmem:[#allocation2 + $0x20] sm:$0xff] %v73_v22 }
  0x19   :  { %76 = vst [vmem:[#allocation2 + $0x8] sm:$0xff] %v75_v23 }
  0x1a   :  { %82 = vsyncadd [#allocation3], 3072  ;;  %v1490_v24 = vld [vmem:[%s1969_s2 + $0x38] sm:$0xff]  ;;  %v111_v25 = vld [vmem:[%s1969_s2 + $0x68] sm:$0xf]  ;;  %vm208_vm0 = vcmask 1043456  }
  0x1b   :  { %v176_v26 = vunpack.c.l.b16 %v111_v25  ;;  %212 = vmatpush.bf16.msra.mxu0 %v1490_v24  ;;  %v1489_v27 = vld [vmem:[%s1969_s2 + $0x30] sm:$0xff]  ;;  %v1495_v30 = vld [vmem:[%s1969_s2 + $0x60] sm:$0xff]  ;;  %v1488_v31 = vld [vmem:[%s1969_s2 + $0x28] sm:$0xff]  ;;  %vm204_vm1 = vcmask 719872   ;;  %vm291_vm2 = vcmask 785408   ;;  %s1577_s24 = smov 96  }
  0x1c   :  { %v1501_v32 = vld [vmem:[%s1969_s2 + $0x98] sm:$0xff]  ;;  %v1507_v33 = vld [vmem:[%s1969_s2 + $0xc8] sm:$0xff]  ;;  %v1487_v35 = vld [vmem:[%s1969_s2 + $0x20] sm:$0xff]  ;;  %s1578_s27 = smov 64   ;;  %vm472_vm3 = vcmask 130048   ;;  %vm411_vm4 = vcmask 261120  }
  0x1d   :  { %v190_v28 = vpack.c.b16 %v176_v26, %v176_v26  ;;  %297 = vmatpush.bf16.msra.mxu2 %v1501_v32  ;;  %358 = vmatpush.bf16.msra.mxu3 %v1507_v33  ;;  %v1494_v34 = vld [vmem:[%s1969_s2 + $0x58] sm:$0xff]  ;;  %v1493_v36 = vld [vmem:[%s1969_s2 + $0x50] sm:$0xff]  ;;  %v1492_v38 = vld [vmem:[%s1969_s2 + $0x48] sm:$0xff]  ;;  %vm609_vm5 = vcmask 523264  }
  0x1e   :  { %v1486_v37 = vld [vmem:[%s1969_s2 + $0x18] sm:$0xff]  ;;  %v1485_v39 = vld [vmem:[%s1969_s2 + $0x10] sm:$0xff]  ;;  %v1491_v40 = vld [vmem:[%s1969_s2 + $0x40] sm:$0xff] }
  0x1f   :  { %v210_v29 = vsel %vm208_vm0, %v190_v28, 0  ;;  %213 = vmatpush.bf16.msra.mxu0 %v1489_v27  ;;  %v1484_v41 = vld [vmem:[%s1969_s2 + $0x8] sm:$0xff]  ;;  %v1481_v42 = vld [vmem:[%s1968_s1 + $0x4] sm:$0xf]  ;;  %v1146_v46 = vld [vmem:[%s1968_s1] sm:$0xf] }
  0x20   :  { %228 = vmatpush.bf16.msra.mxu1 %v210_v29  ;;  %v1148_v43 = vld [vmem:[%s1968_s1 + $0x8] sm:$0x30]  ;;  %v1483_v45 = vld [vmem:[%s1969_s2] sm:$0xff]  ;;  %v1482_v47 = vld [vmem:[%s1968_s1 + $0x4] sm:$0x30] }
  0x21   :  { %v1151_v44 = vor.u32 %v1481_v42, %v1148_v43  ;;  %v1147_v48 = vor.u32 %v1482_v47, %v1146_v46  ;;  %v1500_v49 = vld [vmem:[%s1969_s2 + $0x90] sm:$0xff]  ;;  %v1506_v50 = vld [vmem:[%s1969_s2 + $0xc0] sm:$0xff]  ;;  %v1499_v51 = vld [vmem:[%s1969_s2 + $0x88] sm:$0xff] }
  0x22   :  { %298 = vmatpush.bf16.msra.mxu2 %v1500_v49  ;;  %359 = vmatpush.bf16.msra.mxu3 %v1506_v50  ;;  %v1505_v52 = vld [vmem:[%s1969_s2 + $0xb8] sm:$0xff]  ;;  %v1498_v53 = vld [vmem:[%s1969_s2 + $0x80] sm:$0xff]  ;;  %v1504_v54 = vld [vmem:[%s1969_s2 + $0xb0] sm:$0xff] }
  0x23   :  { %214 = vmatpush.bf16.msra.mxu0 %v1488_v31  ;;  %v1497_v55 = vld [vmem:[%s1969_s2 + $0x78] sm:$0xff]  ;;  %v1503_v56 = vld [vmem:[%s1969_s2 + $0xa8] sm:$0xff]  ;;  %v1496_v57 = vld [vmem:[%s1969_s2 + $0x70] sm:$0xff] }
  0x24   :  { %229 = vmatpush.bf16.msra.mxu1 %v1495_v30  ;;  %v1502_v58 = vld [vmem:[%s1969_s2 + $0xa0] sm:$0xff]  ;;  %v1509_v13 = vld [vmem:[%s1969_s2 + $0xd8] sm:$0xff]  ;;  %v1508_v17 = vld [vmem:[%s1969_s2 + $0xd0] sm:$0xff] }
  0x25   :  { %v1563_v61 = vld [vmem:[%s1970_s3] ss:$0 sm:$0xff]  ;;  %v1512_v18 = vld [vmem:[%s1969_s2 + $0xf0] sm:$0xff]  ;;  %v1511_v21 = vld [vmem:[%s1969_s2 + $0xe8] sm:$0xff] }
  0x26   :  { %299 = vmatpush.bf16.msra.mxu2 %v1499_v51  ;;  %360 = vmatpush.bf16.msra.mxu3 %v1505_v52  ;;  %v1510_v19 = vld [vmem:[%s1969_s2 + $0xe0] sm:$0xff]  ;;  %v1520_v32 = vld [vmem:[%s1969_s2 + $0x130] sm:$0xff]  ;;  %v1519_v33 = vld [vmem:[%s1969_s2 + $0x128] sm:$0xff] }
  0x27   :  { %215 = vmatpush.bf16.msra.mxu0 %v1487_v35  ;;  %v429_v20 = vld [vmem:[%s1967_s0] sm:$0x3]  ;;  %v1513_v47 = vld [vmem:[%s1969_s2 + $0xf8] sm:$0xff]  ;;  %v1523_v49 = vld [vmem:[%s1969_s2 + $0x148] sm:$0xff] }
  0x28   :  { %230 = vmatpush.bf16.msra.mxu1 %v1494_v34  ;;  %v432_v22 = vpack.c.bf16 %v429_v20, %v429_v20  ;;  %v1564_v26 = vld [vmem:[%s1970_s3 + $0x1] ss:$0 sm:$0xff]  ;;  %v1566_v51 = vld [vmem:[%s1970_s3 + $0x3] ss:$0 sm:$0xff] }
  0x29   :  { %v1518_v35 = vld [vmem:[%s1969_s2 + $0x120] sm:$0xff] }
  0x2a   :  { %300 = vmatpush.bf16.msra.mxu2 %v1498_v53  ;;  %361 = vmatpush.bf16.msra.mxu3 %v1504_v54  ;;  %v1514_v46 = vld [vmem:[%s1969_s2 + $0x100] sm:$0xff] }
  0x2b   :  { %216 = vmatpush.bf16.msra.mxu0 %v1486_v37  ;;  %v1522_v50 = vld [vmem:[%s1969_s2 + $0x140] sm:$0xff] }
  0x2c   :  { %231 = vmatpush.bf16.msra.mxu1 %v1493_v36  ;;  %v1517_v36 = vld [vmem:[%s1969_s2 + $0x118] sm:$0xff] }
  0x2e   :  { %301 = vmatpush.bf16.msra.mxu2 %v1497_v55  ;;  %362 = vmatpush.bf16.msra.mxu3 %v1503_v56 }
  0x2f   :  { %217 = vmatpush.bf16.msra.mxu0 %v1485_v39  ;;  %v1515_v39 = vld [vmem:[%s1969_s2 + $0x108] sm:$0xff] }
  0x30   :  { %232 = vmatpush.bf16.msra.mxu1 %v1492_v38  ;;  %v1516_v38 = vld [vmem:[%s1969_s2 + $0x110] sm:$0xff] }
  0x32   :  { %302 = vmatpush.bf16.msra.mxu2 %v1496_v57  ;;  %363 = vmatpush.bf16.msra.mxu3 %v1502_v58  ;;  %v1521_v58 = vld [vmem:[%s1969_s2 + $0x138] sm:$0xff] }
  0x33   :  { %218 = vmatpush.bf16.msra.mxu0 %v1484_v41 }
  0x34   :  { %233 = vmatpush.bf16.msra.mxu1 %v1491_v40  ;;  %v1565_v40 = vld [vmem:[%s1970_s3 + $0x2] ss:$0 sm:$0xff] }
  0x36   :  { %459 = vmatpush.bf16.msrb.mxu2 %v1512_v18  ;;  %483 = vmatpush.bf16.msrb.mxu3 %v1510_v19 }
  0x37   :  { %1204 = vmatmul.msk.bf16.vlgmr.msra.gmra.mxu1 %vm204_vm1, %v1151_v44  ;;  %219 = vmatpush.bf16.msra.mxu0 %v1483_v45 }
  0x38   :  { %421 = vmatpush.bf16.msrb.mxu1 %v1509_v13 }
  0x3a   :  { %220 = vmatmul.bf16.vlgmr.msra.gmra.mxu0 %v1147_v48  ;;  %460 = vmatpush.bf16.msrb.mxu2 %v1511_v21  ;;  %v1524_v48 = vld [vmem:[%s1969_s2 + $0x150] sm:$0xff] }
  0x3b   :  { %560 = vmatpush.bf16.msrb.mxu0 %v1520_v32 }
  0x3c   :  { %422 = vmatpush.bf16.msrb.mxu1 %v1508_v17 }
  0x3f   :  { %561 = vmatpush.bf16.msrb.mxu0 %v1519_v33 }
  0x40   :  { %617 = vmatpush.bf16.msra.mxu1 %v1524_v48 }
  0x43   :  { %562 = vmatpush.bf16.msrb.mxu0 %v1518_v35 }
  0x44   :  { %618 = vmatpush.bf16.msra.mxu1 %v1523_v49 }
  0x47   :  { %563 = vmatpush.bf16.msrb.mxu0 %v1517_v36 }
  0x48   :  { %619 = vmatpush.bf16.msra.mxu1 %v1522_v50 }
  0x4b   :  { %564 = vmatpush.bf16.msrb.mxu0 %v1516_v38 }
  0x4c   :  { %620 = vmatpush.bf16.msra.mxu1 %v1521_v58 }
  0x4f   :  { %565 = vmatpush.bf16.msrb.mxu0 %v1515_v39 }
  0x53   :  { %566 = vmatpush.bf16.msrb.mxu0 %v1514_v46 }
  0x57   :  { %567 = vmatpush.bf16.msrb.mxu0 %v1513_v47 }
  0xb4   :  { %v235_v59 = vpop.f32.mrf.mxu1 }
  0xb7   :  { %v221_v60 = vpop.f32.mrf.mxu0 }
  0xb8   :  { %v222_v62 = vadd.f32 %v1563_v61, %v221_v60 }
  0xba   :  { %v236_v0 = vadd.f32 %v235_v59, %v222_v62  ;;  %v1567_v59 = vld [vmem:[%s1970_s3 + $0x4] ss:$0 sm:$0xff] }
  0xbc   :  { %v237_v2 = vpop.f32.mrf.mxu1  ;;  %v240_v4 = vmax.f32 %v236_v0, 0.0 }
  0xbf   :  { %v223_v63 = vpop.f32.mrf.mxu0 }
  0xc0   :  { %v224_v1 = vadd.f32 %v1563_v61, %v223_v63 }
  0xc2   :  { %v238_v3 = vadd.f32 %v237_v2, %v224_v1  ;;  %v1568_v1 = vld [vmem:[%s1970_s3 + $0x5] ss:$0 sm:$0xff] }
  0xc4   :  { %v241_v5 = vmax.f32 %v238_v3, 0.0 }
  0xc6   :  { %v242_v6 = vpack.c.bf16 %v241_v5, %v240_v4 }
  0xc8   :  { %1229 = vmatmul.msk.bf16.vlgmr.msra.gmra.mxu2 %vm291_vm2, %v242_v6  ;;  %1254 = vmatmul.msk.bf16.vlgmr.msra.gmra.mxu3 %vm291_vm2, %v242_v6 }
  0xd8   :  { %1277 = vmatmul.msk.bf16.vlgmr.msrb.gmra.mxu3 %vm472_vm3, %v432_v22 }
 0x14b   :  { %v304_v7 = vpop.f32.mrf.mxu2  ;;  %v365_v8 = vpop.f32.mrf.mxu3 }
 0x14c   :  { %v370_v9 = vrot.slane %v304_v7, 2 }
 0x14e   :  { %371 = vrot.lane.b32.xlu0 %v370_v9, %s1577_s24 }
 0x153   :  { %v306_v10 = vpop.f32.mrf.mxu2  ;;  %v366_v11 = vpop.f32.mrf.mxu3 }
 0x154   :  { %v376_v12 = vrot.slane %v366_v11, 2 }
 0x156   :  { %377 = vrot.lane.b32.xlu0 %v376_v12, %s1577_s24 }
 0x15b   :  { %v485_v34 = vpop.f32.mrf.mxu3 }
 0x163   :  { %v487_v37 = vpop.f32.mrf.mxu3 }
 0x1c0   :  { %v372_v14 = vpop.permute.xlu0 %371 }
 0x1c1   :  { %v374_v15 = vadd.f32 %v372_v14, %v304_v7 }
 0x1c3   :  { %v382_v16 = vrot.slane %v374_v15, 4 }
 0x1c5   :  { %383 = vrot.lane.b32.xlu1 %v382_v16, %s1578_s27 }
 0x1c8   :  { %v378_v23 = vpop.permute.xlu0 %377 }
 0x1c9   :  { %v380_v25 = vadd.f32 %v378_v23, %v366_v11 }
 0x237   :  { %v384_v24 = vpop.permute.xlu1 %383 }
 0x238   :  { %v386_v27 = vadd.f32 %v384_v24, %v374_v15 }
 0x23a   :  { %v387_v28 = vadd.f32 %v386_v27, %v380_v25 }
 0x23c   :  { %v390_v29 = vadd.f32 %v1564_v26, %v387_v28 }
 0x23e   :  { %v391_v30 = vmax.f32 %v390_v29, 0.0 }
 0x240   :  { %v396_v31 = vpack.c.bf16 %v391_v30, %v391_v30 }
 0x242   :  { %1263 = vmatmul.msk.bf16.vlgmr.msrb.gmra.mxu1 %vm411_vm4, %v396_v31 }
 0x2bf   :  { %v424_v41 = vpop.f32.mrf.mxu1 }
 0x2c0   :  { %v425_v42 = vadd.f32 %v1565_v40, %v424_v41 }
 0x2c2   :  { %v428_v43 = vmax.f32 %v425_v42, 0.0 }
 0x2c4   :  { %v437_v44 = vpack.c.bf16 %v428_v43, %v428_v43 }
 0x2c6   :  { %1272 = vmatmul.msk.bf16.vlgmr.msrb.gmra.mxu2 %vm411_vm4, %v437_v44 }
 0x2c7   :  { %v426_v45 = vpop.f32.mrf.mxu1 }
 0x349   :  { %v462_v52 = vpop.f32.mrf.mxu2 }
 0x34a   :  { %v486_v53 = vadd.f32 %v485_v34, %v462_v52 }
 0x34c   :  { %v491_v54 = vadd.f32 %v1566_v51, %v486_v53 }
 0x34e   :  { %v492_v55 = vmax.f32 %v491_v54, 0.0 }
 0x350   :  { %v509_v56 = vpack.c.bf16 %v492_v55, %v492_v55 }
 0x351   :  { %v464_v57 = vpop.f32.mrf.mxu2 }
 0x352   :  { %568 = vmatmul.bf16.vlgmr.msrb.gmra.mxu0 %v509_v56 }
 0x3cf   :  { %v569_v60 = vpop.f32.mrf.mxu0 }
 0x3d0   :  { %v570_v61 = vadd.f32 %v1567_v59, %v569_v60 }
 0x3d2   :  { %v573_v62 = vmax.f32 %v570_v61, 0.0 }
 0x3d4   :  { %v582_v63 = vpack.c.bf16 %v573_v62, %v573_v62 }
 0x3d6   :  { %1326 = vmatmul.msk.bf16.vlgmr.msra.gmra.mxu1 %vm609_vm5, %v582_v63 }
 0x3d7   :  { %v571_v0 = vpop.f32.mrf.mxu0 }
 0x453   :  { %v622_v2 = vpop.f32.mrf.mxu1 }
 0x454   :  { %v623_v3 = vadd.f32 %v1568_v1, %v622_v2 }
 0x456   :  { %v626_v4 = vmax.f32 %v623_v3, 0.0 }
 0x45b   :  { %v624_v5 = vpop.f32.mrf.mxu1 }
 0x45c   :  { %1575 = dma.done.wait [#allocation3], 3072 }
 0x45d   :  { %1576 = vsyncadd [#allocation3], 4294964224  ;;  %v1528_v6 = vld [vmem:[#allocation2 + $0x48] sm:$0xff]  ;;  %v1527_v7 = vld [vmem:[#allocation2 + $0x10] sm:$0xff]  ;;  %v1872_v15 = vpack.c.bf16 %v626_v4, %v626_v4 }
 0x45e   :  { %673 = vmatpush.bf16.msra.mxu2 %v1528_v6  ;;  %v1849_v8 = vld [vmem:[%s1969_s2 + $0x130] sm:$0xff]  ;;  %v1855_v9 = vld [vmem:[%s1969_s2 + $0x128] sm:$0xff]  ;;  %v1526_v10 = vld [vmem:[#allocation2] sm:$0xff] }
 0x45f   :  { %750 = vmatpush.bf16.msra.mxu3 %v1849_v8  ;;  %874 = vmatpush.bf16.msra.mxu0 %v1849_v8  ;;  %v1862_v11 = vld [vmem:[%s1969_s2 + $0x120] sm:$0xff]  ;;  %v1525_v12 = vld [vmem:[#allocation2 + $0xb0] sm:$0xff]  ;;  %v1548_v13 = vld [vmem:[#allocation2 + $0x98] sm:$0xff] }
 0x460   :  { %v1869_v14 = vld [vmem:[%s1969_s2 + $0x118] sm:$0xff]  ;;  %v1878_v17 = vld [vmem:[%s1969_s2 + $0x110] sm:$0xff]  ;;  %v1887_v19 = vld [vmem:[%s1969_s2 + $0x108] sm:$0xff] }
 0x461   :  { %v1547_v16 = vld [vmem:[#allocation2 + $0x18] sm:$0xff]  ;;  %v1546_v18 = vld [vmem:[#allocation2 + $0x90] sm:$0xff]  ;;  %v1545_v20 = vld [vmem:[#allocation2 + $0x88] sm:$0xff] }
 0x462   :  { %674 = vmatpush.bf16.msra.mxu2 %v1527_v7  ;;  %v1897_v21 = vld [vmem:[%s1969_s2 + $0x100] sm:$0xff]  ;;  %v1904_v22 = vld [vmem:[%s1969_s2 + $0xf8] sm:$0xff]  ;;  %v1540_v23 = vld [vmem:[%s1969_s2 + $0x150] sm:$0xff] }
 0x463   :  { %751 = vmatpush.bf16.msra.mxu3 %v1855_v9  ;;  %875 = vmatpush.bf16.msra.mxu0 %v1855_v9  ;;  %v1914_v24 = vld [vmem:[%s1969_s2 + $0x148] sm:$0xff]  ;;  %v1569_v25 = vld [vmem:[%s1970_s3 + $0x6] ss:$0 sm:$0xff]  ;;  %v1570_v31 = vld [vmem:[%s1970_s3 + $0x7] ss:$0 sm:$0xff] }
 0x464   :  { %806 = vmatpush.bf16.msrb.mxu1 %v1540_v23  ;;  %v1538_v37 = vld [vmem:[%s1969_s2 + $0x140] sm:$0xff]  ;;  %v1537_v38 = vld [vmem:[%s1969_s2 + $0x138] sm:$0xff]  ;;  %v1555_v48 = vld [vmem:[#allocation2 + $0x30] sm:$0xff] }
 0x465   :  { %v1933_v39 = vld [vmem:[%s1970_s3 + $0x4] ss:$0 sm:$0xff]  ;;  %v1556_v43 = vld [vmem:[#allocation2 + $0x58] sm:$0xff]  ;;  %v1551_v50 = vld [vmem:[#allocation2 + $0x70] sm:$0xff] }
 0x466   :  { %675 = vmatpush.bf16.msra.mxu2 %v1526_v10  ;;  %v1544_v45 = vld [vmem:[#allocation2 + $0x78] sm:$0xff]  ;;  %v1552_v46 = vld [vmem:[#allocation2 + $0xa0] sm:$0xff]  ;;  %v1554_v53 = vld [vmem:[#allocation2 + $0x68] sm:$0xff] }
 0x467   :  { %752 = vmatpush.bf16.msra.mxu3 %v1862_v11  ;;  %876 = vmatpush.bf16.msra.mxu0 %v1862_v11  ;;  %v1543_v49 = vld [vmem:[#allocation2 + $0x40] sm:$0xff]  ;;  %v1553_v55 = vld [vmem:[#allocation2 + $0xa8] sm:$0xff]  ;;  %v1550_v59 = vld [vmem:[#allocation2 + $0x50] sm:$0xff] }
 0x468   :  { %807 = vmatpush.bf16.msrb.mxu1 %v1914_v24  ;;  %v1542_v58 = vld [vmem:[#allocation2 + $0x28] sm:$0xff]  ;;  %v1541_v60 = vld [vmem:[#allocation2 + $0x60] sm:$0xff]  ;;  %v1549_v61 = vld [vmem:[#allocation2 + $0x38] sm:$0xff] }
 0x469   :  { %v1572_v62 = vld [vmem:[%s1970_s3 + $0x5] ss:$0 sm:$0xff] }
 0x46a   :  { %676 = vmatpush.bf16.msra.mxu2 %v1525_v12 }
 0x46b   :  { %753 = vmatpush.bf16.msra.mxu3 %v1869_v14  ;;  %877 = vmatpush.bf16.msra.mxu0 %v1869_v14 }
 0x46c   :  { %808 = vmatpush.bf16.msrb.mxu1 %v1538_v37 }
 0x46d   :  { %1343 = vmatmul.msk.bf16.vlgmr.msra.gmra.mxu2 %vm609_vm5, %v1872_v15 }
 0x46e   :  { %863 = vmatpush.bf16.msrb.mxu2 %v1548_v13 }
 0x46f   :  { %754 = vmatpush.bf16.msra.mxu3 %v1878_v17  ;;  %878 = vmatpush.bf16.msra.mxu0 %v1878_v17 }
 0x470   :  { %809 = vmatpush.bf16.msrb.mxu1 %v1537_v38 }
 0x472   :  { %864 = vmatpush.bf16.msrb.mxu2 %v1547_v16 }
 0x473   :  { %755 = vmatpush.bf16.msra.mxu3 %v1887_v19  ;;  %879 = vmatpush.bf16.msra.mxu0 %v1887_v19 }
 0x474   :  { %896 = vmatpush.bf16.msra.mxu1 %v1540_v23 }
 0x476   :  { %865 = vmatpush.bf16.msrb.mxu2 %v1546_v18  ;;  %v1559_v18 = vld [vmem:[#allocation2 + $0x20] sm:$0xff] }
 0x477   :  { %756 = vmatpush.bf16.msra.mxu3 %v1897_v21  ;;  %880 = vmatpush.bf16.msra.mxu0 %v1897_v21 }
 0x478   :  { %897 = vmatpush.bf16.msra.mxu1 %v1914_v24 }
 0x47a   :  { %866 = vmatpush.bf16.msrb.mxu2 %v1545_v20 }
 0x47b   :  { %757 = vmatpush.bf16.msra.mxu3 %v1904_v22  ;;  %881 = vmatpush.bf16.msra.mxu0 %v1904_v22 }
 0x47c   :  { %898 = vmatpush.bf16.msra.mxu1 %v1538_v37 }
 0x47d   :  { %1409 = vmatmul.msk.bf16.vlgmr.msrb.gmra.mxu2 %vm609_vm5, %v1872_v15 }
 0x47e   :  { %946 = vmatpush.bf16.msra.mxu2 %v1552_v46 }
 0x47f   :  { %986 = vmatpush.bf16.msrb.mxu3 %v1544_v45 }
 0x480   :  { %899 = vmatpush.bf16.msra.mxu1 %v1537_v38 }
 0x482   :  { %947 = vmatpush.bf16.msra.mxu2 %v1551_v50 }
 0x483   :  { %987 = vmatpush.bf16.msrb.mxu3 %v1543_v49 }
 0x486   :  { %948 = vmatpush.bf16.msra.mxu2 %v1550_v59 }
 0x487   :  { %988 = vmatpush.bf16.msrb.mxu3 %v1542_v58 }
 0x48a   :  { %949 = vmatpush.bf16.msra.mxu2 %v1549_v61 }
 0x48b   :  { %989 = vmatpush.bf16.msrb.mxu3 %v1541_v60 }
 0x48e   :  { %1044 = vmatpush.bf16.msrb.mxu2 %v1849_v8 }
 0x492   :  { %1045 = vmatpush.bf16.msrb.mxu2 %v1855_v9  ;;  %v1573_v9 = vld [vmem:[%s1970_s3 + $0x8] ss:$0 sm:$0xff] }
 0x496   :  { %1046 = vmatpush.bf16.msrb.mxu2 %v1862_v11 }
 0x49a   :  { %1047 = vmatpush.bf16.msrb.mxu2 %v1869_v14 }
 0x49e   :  { %1048 = vmatpush.bf16.msrb.mxu2 %v1878_v17  ;;  %v1560_v17 = vld [vmem:[#allocation2 + $0x8] sm:$0xff] }
 0x49f   :  { %1116 = vmatpush.bf16.msrb.mxu0 %v1560_v17 }
 0x4a2   :  { %1049 = vmatpush.bf16.msrb.mxu2 %v1887_v19  ;;  %v1558_v19 = vld [vmem:[#allocation2 + $0xb8] sm:$0xff] }
 0x4a3   :  { %1117 = vmatpush.bf16.msrb.mxu0 %v1559_v18 }
 0x4a6   :  { %1050 = vmatpush.bf16.msrb.mxu2 %v1897_v21 }
 0x4a7   :  { %1118 = vmatpush.bf16.msrb.mxu0 %v1558_v19 }
 0x4aa   :  { %1051 = vmatpush.bf16.msrb.mxu2 %v1904_v22 }
 0x4f0   :  { %v678_v26 = vpop.f32.mrf.mxu2 }
 0x4f1   :  { %v679_v27 = vadd.f32 %v1569_v25, %v678_v26 }
 0x4f3   :  { %v682_v28 = vmax.f32 %v679_v27, 0.0 }
 0x4f5   :  { %v699_v29 = vpack.c.bf16 %v682_v28, %v682_v28  ;;  %v1557_v28 = vld [vmem:[#allocation2 + $0x80] sm:$0xff] }
 0x4f6   :  { %1119 = vmatpush.bf16.msrb.mxu0 %v1557_v28 }
 0x4f7   :  { %758 = vmatmul.bf16.vlgmr.msra.gmra.mxu3 %v699_v29 }
 0x4f8   :  { %v680_v30 = vpop.f32.mrf.mxu2  ;;  %1066 = vmatpush.bf16.msra.mxu3 %v1540_v23 }
 0x4fc   :  { %1067 = vmatpush.bf16.msra.mxu3 %v1914_v24 }
 0x500   :  { %v868_v32 = vpop.f32.mrf.mxu2  ;;  %1068 = vmatpush.bf16.msra.mxu3 %v1538_v37 }
 0x501   :  { %v869_v33 = vadd.f32 %v1570_v31, %v868_v32 }
 0x503   :  { %v872_v34 = vmax.f32 %v869_v33, 0.0 }
 0x504   :  { %1069 = vmatpush.bf16.msra.mxu3 %v1537_v38 }
 0x505   :  { %v873_v35 = vpack.c.bf16 %v872_v34, %v872_v34  ;;  %v1574_v34 = vld [vmem:[%s1970_s3 + $0x9] ss:$0 sm:$0xff] }
 0x507   :  { %882 = vmatmul.bf16.vlgmr.msra.gmra.mxu0 %v873_v35 }
 0x508   :  { %v870_v36 = vpop.f32.mrf.mxu2 }
 0x57a   :  { %v759_v40 = vpop.f32.mrf.mxu3 }
 0x57b   :  { %v760_v41 = vadd.f32 %v1933_v39, %v759_v40 }
 0x57d   :  { %v763_v42 = vmax.f32 %v760_v41, 0.0 }
 0x57f   :  { %v772_v44 = vpack.c.bf16 %v763_v42, %v763_v42 }
 0x581   :  { %1392 = vmatmul.msk.bf16.vlgmr.msrb.gmra.mxu1 %vm609_vm5, %v772_v44 }
 0x582   :  { %v761_v47 = vpop.f32.mrf.mxu3  ;;  %1033 = vmatpush.bf16.msrb.mxu1 %v1556_v43 }
 0x584   :  { %v883_v51 = vpop.f32.mrf.mxu0 }
 0x585   :  { %v884_v52 = vadd.f32 %v1933_v39, %v883_v51 }
 0x586   :  { %1034 = vmatpush.bf16.msrb.mxu1 %v1555_v48 }
 0x587   :  { %v887_v54 = vmax.f32 %v884_v52, 0.0 }
 0x589   :  { %v888_v57 = vpack.c.bf16 %v887_v54, %v887_v54 }
 0x58a   :  { %1035 = vmatpush.bf16.msrb.mxu1 %v1554_v53 }
 0x58c   :  { %v885_v56 = vpop.f32.mrf.mxu0 }
 0x58e   :  { %1036 = vmatpush.bf16.msrb.mxu1 %v1553_v55 }
 0x591   :  { %1410 = vmatmul.msk.bf16.vlgmr.msra.gmra.mxu1 %vm609_vm5, %v888_v57 }
 0x5a1   :  { %1461 = vmatmul.msk.bf16.vlgmr.msrb.gmra.mxu1 %vm609_vm5, %v1872_v15 }
 0x5fe   :  { %v811_v63 = vpop.f32.mrf.mxu1 }
 0x5ff   :  { %v812_v0 = vadd.f32 %v1572_v62, %v811_v63 }
 0x601   :  { %v815_v1 = vmax.f32 %v812_v0, 0.0 }
 0x603   :  { %v824_v2 = vpack.c.bf16 %v815_v1, %v815_v1 }
 0x605   :  { %1444 = vmatmul.msk.bf16.vlgmr.msrb.gmra.mxu3 %vm609_vm5, %v824_v2 }
 0x606   :  { %v813_v3 = vpop.f32.mrf.mxu1 }
 0x60e   :  { %v901_v4 = vpop.f32.mrf.mxu1 }
 0x60f   :  { %v902_v5 = vadd.f32 %v1572_v62, %v901_v4 }
 0x611   :  { %v905_v6 = vmax.f32 %v902_v5, 0.0 }
 0x613   :  { %v914_v7 = vpack.c.bf16 %v905_v6, %v905_v6 }
 0x615   :  { %1427 = vmatmul.msk.bf16.vlgmr.msra.gmra.mxu2 %vm609_vm5, %v914_v7 }
 0x616   :  { %v903_v8 = vpop.f32.mrf.mxu1 }
 0x61e   :  { %v1038_v10 = vpop.f32.mrf.mxu1 }
 0x61f   :  { %v1039_v11 = vadd.f32 %v1573_v9, %v1038_v10 }
 0x621   :  { %v1042_v12 = vmax.f32 %v1039_v11, 0.0 }
 0x623   :  { %v1043_v13 = vpack.c.bf16 %v1042_v12, %v1042_v12 }
 0x625   :  { %1052 = vmatmul.bf16.vlgmr.msrb.gmra.mxu2 %v1043_v13 }
 0x626   :  { %v1040_v14 = vpop.f32.mrf.mxu1 }
 0x688   :  { %v991_v15 = vpop.f32.mrf.mxu3 }
 0x690   :  { %v993_v16 = vpop.f32.mrf.mxu3 }
 0x698   :  { %v951_v20 = vpop.f32.mrf.mxu2 }
 0x699   :  { %v992_v21 = vadd.f32 %v991_v15, %v951_v20 }
 0x6a0   :  { %v953_v22 = vpop.f32.mrf.mxu2 }
 0x6a8   :  { %v1053_v23 = vpop.f32.mrf.mxu2 }
 0x6a9   :  { %v1054_v24 = vadd.f32 %v1933_v39, %v1053_v23 }
 0x6ab   :  { %v1057_v25 = vmax.f32 %v1054_v24, 0.0 }
 0x6ad   :  { %v1058_v26 = vpack.c.bf16 %v1057_v25, %v1057_v25 }
 0x6af   :  { %1462 = vmatmul.msk.bf16.vlgmr.msra.gmra.mxu3 %vm609_vm5, %v1058_v26 }
 0x6b0   :  { %v1055_v27 = vpop.f32.mrf.mxu2 }
 0x732   :  { %v1071_v29 = vpop.f32.mrf.mxu3 }
 0x733   :  { %v1072_v30 = vadd.f32 %v1572_v62, %v1071_v29 }
 0x735   :  { %v1075_v31 = vmax.f32 %v1072_v30, 0.0 }
 0x737   :  { %v1084_v32 = vpack.c.bf16 %v1075_v31, %v1075_v31 }
 0x739   :  { %1479 = vmatmul.msk.bf16.vlgmr.msrb.gmra.mxu0 %vm609_vm5, %v1084_v32 }
 0x73a   :  { %v1073_v33 = vpop.f32.mrf.mxu3 }
 0x7b6   :  { %v1121_v35 = vpop.f32.mrf.mxu0 }
 0x7b7   :  { %v1125_v36 = vadd.f32 %v1121_v35, %v992_v21 }
 0x7b9   :  { %v1128_v37 = vadd.f32 %v1574_v34, %v1125_v36 }
 0x7bb   :  { %1129 = vst [vmem:[%s1972_s5] sm:$0x3] %v1128_v37 }
 0x7be   :  { %v1123_v38 = vpop.f32.mrf.mxu0 }
 0x7bf   :  { %1134 = vsyncmov [#allocation3] }
 0x7c2   :  { %s1135_s25 = vpop.sfrf %1134 }
 0x7c3   :  { %p1480_p0 = scmp.ne.s32.totalorder %s1135_s25, 0 }
 0x7c5   :  { %1139 = shalt.err (%p1480_p0)  }

</bundles_post_ra>
